<compile_context>
chip_gen: v7x
topology: tpu7x:2x2x1
jax: 0.10.0
libtpu: 0.0.40
codegen_flags: <defaults>
</compile_context>

<pallas_src>
import math

import jax
import jax.numpy as jnp
import numpy as np
from jax.experimental import pallas as pl
from jax.experimental.pallas import tpu as pltpu

_VMEM_LIMIT_BYTES = 32 * 1024 * 1024   # explicit scoped-VMEM limit (>= v5e's 16 MiB default)
_VMEM_BUDGET = 12 * 1024 * 1024        # target per-step working set (headroom for scratch)
_MAX_PLANES_PER_BLOCK = 16             # caps the static per-plane unroll inside the kernel


def _nearest_src_indices(out_size: int, in_size: int) -> np.ndarray:
    """PyTorch 'nearest' rule: src = min(floor(dst * in/out), in - 1), float32 math."""
    scale = np.float32(in_size) / np.float32(out_size)
    idx = np.floor(np.arange(out_size, dtype=np.float32) * scale).astype(np.int32)
    return np.minimum(idx, in_size - 1)


def _selection_matrices(src_h, src_w, H, W, Ho, Wo):
    R = np.zeros((Ho, H), dtype=np.float32)
    R[np.arange(Ho), src_h] = 1.0                     # output row <- input row
    S = np.zeros((W, Wo), dtype=np.float32)
    S[src_w, np.arange(Wo)] = 1.0                     # output col <- input col
    return R, S


def _upsample_plane_kernel(r_ref, s_ref, x_ref, o_ref):
    # r_ref: (Ho, H)    one-hot row selection   (VMEM-resident, constant index_map)
    # s_ref: (W, TWo)   one-hot column selection (VMEM-resident unless Wo is tiled)
    # x_ref: (B, H, W)  input plane block
    # o_ref: (B, Ho, TWo) output plane block
    r = r_ref[...]
    s = s_ref[...]
    nb = x_ref.shape[0]
    for b in range(nb):  # static unroll, nb <= _MAX_PLANES_PER_BLOCK
        # Width expansion then height expansion; one-hot selection -> exact.
        t = jnp.dot(x_ref[b], s, preferred_element_type=jnp.float32)        # (H, TWo)
        y = jnp.dot(r, t.astype(r.dtype), preferred_element_type=jnp.float32)  # (Ho, TWo)
        o_ref[b] = y.astype(o_ref.dtype)


def _choose_tiling(NC, H, W, Ho, Wo, isz):
    """Pick (planes per block, output-column tile) under the VMEM budget."""

    def usage(nb, two):
        sel = 2 * (Ho * H + W * two) * isz        # R + S (pipeline keeps 2 buffers)
        io = 2 * nb * (H * W + Ho * two) * isz    # x / out blocks, double-buffered
        tmp = (H + Ho) * two * 4                  # in-kernel f32 temporaries (1 plane live)
        return sel + io + tmp

    # Output-column tile: prefer the full extent; otherwise a 128-multiple divisor of Wo.
    cands = [Wo]
    t = 128
    while t < Wo:
        if Wo % t == 0:
            cands.append(t)
        t *= 2
    cands = sorted(set(cands), reverse=True)
    two = cands[-1]
    for c in cands:
        if usage(1, c) <= _VMEM_BUDGET:
            two = c
            break

    # Planes per block: largest divisor of N*C that fits the budget and unroll cap.
    nb = 1
    for b in range(1, min(NC, _MAX_PLANES_PER_BLOCK) + 1):
        if NC % b == 0 and usage(b, two) <= _VMEM_BUDGET:
            nb = b
    # Keep >= 2 blocks along the plane axis so both v7x TensorCores get work.
    if NC >= 2 and NC // nb < 2:
        for b in range(nb - 1, 0, -1):
            if NC % b == 0 and NC // b >= 2:
                nb = b
                break
    return nb, two


def upsample_nearest(x, size=None, scale_factor=None):
    """Equivalent of F.interpolate(x, size=size, scale_factor=scale_factor,
    mode='nearest') for NCHW inputs."""
    N, C, H, W = x.shape
    if size is not None:
        if isinstance(size, int):
            Ho, Wo = size, size
        else:
            Ho, Wo = size
    elif scale_factor is not None:
        if isinstance(scale_factor, (int, float)):
            sh = sw = float(scale_factor)
        else:
            sh, sw = scale_factor
        Ho, Wo = int(math.floor(H * sh)), int(math.floor(W * sw))
    else:
        raise ValueError("either size or scale_factor must be given")

    src_h = _nearest_src_indices(Ho, H)
    src_w = _nearest_src_indices(Wo, W)

    orig_dtype = x.dtype
    if jnp.issubdtype(orig_dtype, jnp.floating):
        cdt = orig_dtype
    else:
        # TODO(synk): integer values with |v| >= 2^24 lose exactness through the
        # f32 selection path; fine for image-like data.
        cdt = jnp.float32
    isz = jnp.dtype(cdt).itemsize

    Rnp, Snp = _selection_matrices(src_h, src_w, H, W, Ho, Wo)
    R = jnp.asarray(Rnp, dtype=cdt)                       # (Ho, H)
    S = jnp.asarray(Snp, dtype=cdt)                       # (W, Wo)

    NC = N * C
    x3 = x.reshape(NC, H, W)
    if x3.dtype != cdt:
        x3 = x3.astype(cdt)

    B, TWo = _choose_tiling(NC, H, W, Ho, Wo, isz)
    grid = (NC // B, pl.cdiv(Wo, TWo))

    cost = pl.CostEstimate(
        flops=2 * NC * Wo * H * (W + Ho),
        transcendentals=0,
        bytes_accessed=(NC * (H * W + Ho * Wo) + Ho * H + W * Wo) * isz,
    )

    out = pl.pallas_call(
        _upsample_plane_kernel,
        out_shape=jax.ShapeDtypeStruct((NC, Ho, Wo), orig_dtype),
        grid=grid,
        in_specs=[
            pl.BlockSpec((Ho, H), lambda i, j: (0, 0)),        # R: resident
            pl.BlockSpec((W, TWo), lambda i, j: (0, j)),        # S: resident / column tile
            pl.BlockSpec((B, H, W), lambda i, j: (i, 0, 0)),    # x plane block
        ],
        out_specs=pl.BlockSpec((B, Ho, TWo), lambda i, j: (i, 0, j)),
        compiler_params=pltpu.CompilerParams(
            dimension_semantics=("parallel", "parallel"),
            vmem_limit_bytes=_VMEM_LIMIT_BYTES,
        ),
        cost_estimate=cost,
    )(R, S, x3)

    return out.reshape(N, C, Ho, Wo)


class Upsample:
    """JAX/Pallas port of models.utils.Upsample (mode='nearest' supported)."""

    def __init__(self, size=None, scale_factor=None, mode="nearest",
                 align_corners=False, antialias=False):
        if mode != "nearest":
            # TODO(synk): bilinear/bicubic/antialias modes (dense separable
            # interpolation matrices) are not implemented.
            raise NotImplementedError("only mode='nearest' is implemented")
        self.size = size
        self.scale_factor = scale_factor

    def __call__(self, x):
        return upsample_nearest(x, size=self.size, scale_factor=self.scale_factor)


if __name__ == "__main__":
    key = jax.random.PRNGKey(0)

    # Main case (matches the module's typical usage): NCHW, scale_factor=2.
    N, C, H, W = 2, 4, 16, 16
    x = jax.random.normal(key, (N, C, H, W), dtype=jnp.float32)

    up = Upsample(scale_factor=2.0, mode="nearest")
    y = jax.block_until_ready(up(x))

    src_h = _nearest_src_indices(2 * H, H)
    src_w = _nearest_src_indices(2 * W, W)
    ref = x[:, :, src_h, :][:, :, :, src_w]
    assert y.shape == (N, C, 2 * H, 2 * W), y.shape
    np.testing.assert_allclose(np.asarray(y), np.asarray(ref), rtol=0, atol=0)

    # bf16 stays bf16 end-to-end (no f32 upcast of the data path); selection exact.
    x_bf = x.astype(jnp.bfloat16)
    y_bf = jax.block_until_ready(up(x_bf))
    ref_bf = x_bf[:, :, src_h, :][:, :, :, src_w]
    assert y_bf.dtype == jnp.bfloat16, y_bf.dtype
    np.testing.assert_allclose(np.asarray(y_bf.astype(jnp.float32)),
                               np.asarray(ref_bf.astype(jnp.float32)),
                               rtol=0, atol=0)

    # Non-integer ratio via size=, odd extents, N*C=3 (exercises B=1 tiling).
    x2 = jax.random.normal(jax.random.PRNGKey(1), (1, 3, 16, 12), dtype=jnp.float32)
    y2 = jax.block_until_ready(upsample_nearest(x2, size=(20, 28)))
    sh2 = _nearest_src_indices(20, 16)
    sw2 = _nearest_src_indices(28, 12)
    ref2 = x2[:, :, sh2, :][:, :, :, sw2]
    assert y2.shape == (1, 3, 20, 28), y2.shape
    np.testing.assert_allclose(np.asarray(y2), np.asarray(ref2), rtol=0, atol=0)

    print("KERNEL_OK")
</pallas_src>

<mosaic_0001>
module attributes {stable_mosaic.version = 11 : i64} {
  func.func @_upsample_plane_kernel(%arg0: i32, %arg1: i32, %arg2: memref<32x16xf32, #tpu.memory_space<vmem>>, %arg3: memref<16x32xf32, #tpu.memory_space<vmem>>, %arg4: memref<4x16x16xf32, #tpu.memory_space<vmem>>, %arg5: memref<4x32x32xf32, #tpu.memory_space<vmem>>) attributes {dimension_semantics = [#tpu.dimension_semantics<parallel>, #tpu.dimension_semantics<parallel>], iteration_bounds = array<i64: 2, 1>, scalar_prefetch = 0 : i64, scratch_operands = 0 : i64, tpu.core_type = #tpu.core_type<tc>, window_params = [{pipeline_mode = #tpu.pipeline_mode<synchronous>, transform_indices = @transform_0, window_bounds = array<i64: 32, 16>}, {transform_indices = @transform_1, window_bounds = array<i64: 16, 32>}, {transform_indices = @transform_2, window_bounds = array<i64: 4, 16, 16>}, {transform_indices = @transform_3, window_bounds = array<i64: 4, 32, 32>}]} {
    %c0 = arith.constant 0 : index
    %c0_0 = arith.constant 0 : index
    %0 = vector.load %arg2[%c0, %c0_0] : memref<32x16xf32, #tpu.memory_space<vmem>>, vector<32x16xf32>
    %c0_1 = arith.constant 0 : index
    %c0_2 = arith.constant 0 : index
    %1 = vector.load %arg3[%c0_1, %c0_2] : memref<16x32xf32, #tpu.memory_space<vmem>>, vector<16x32xf32>
    %c0_3 = arith.constant 0 : index
    %c0_4 = arith.constant 0 : index
    %c0_5 = arith.constant 0 : index
    %2 = vector.load %arg4[%c0_3, %c0_4, %c0_5] : memref<4x16x16xf32, #tpu.memory_space<vmem>>, vector<1x16x16xf32>
    %3 = vector.shape_cast %2 : vector<1x16x16xf32> to vector<16x16xf32>
    %cst = arith.constant dense<0.000000e+00> : vector<16x32xf32>
    %4 = tpu.matmul %3, %1, %cst {dimension_numbers = #tpu.dot_dimension_numbers<[1], [0], [0], [1], [0, 0, 1, 1], [], []>} : vector<16x16xf32>, vector<16x32xf32>, vector<16x32xf32> -> vector<16x32xf32>
    %cst_6 = arith.constant dense<0.000000e+00> : vector<32x32xf32>
    %5 = tpu.matmul %0, %4, %cst_6 {dimension_numbers = #tpu.dot_dimension_numbers<[1], [0], [0], [1], [0, 0, 1, 1], [], []>} : vector<32x16xf32>, vector<16x32xf32>, vector<32x32xf32> -> vector<32x32xf32>
    %c0_7 = arith.constant 0 : index
    %c0_8 = arith.constant 0 : index
    %c0_9 = arith.constant 0 : index
    %6 = vector.load %arg5[%c0_7, %c0_8, %c0_9] : memref<4x32x32xf32, #tpu.memory_space<vmem>>, vector<1x32x32xf32>
    %7 = vector.shape_cast %6 : vector<1x32x32xf32> to vector<32x32xf32>
    %8 = vector.shape_cast %5 : vector<32x32xf32> to vector<1x32x32xf32>
    tpu.vector_store %arg5[%c0_7, %c0_8, %c0_9], %8 {strides = array<i32>} : memref<4x32x32xf32, #tpu.memory_space<vmem>>, vector<1x32x32xf32>,
    %c1 = arith.constant 1 : index
    %c0_10 = arith.constant 0 : index
    %c0_11 = arith.constant 0 : index
    %9 = vector.load %arg4[%c1, %c0_10, %c0_11] : memref<4x16x16xf32, #tpu.memory_space<vmem>>, vector<1x16x16xf32>
    %10 = vector.shape_cast %9 : vector<1x16x16xf32> to vector<16x16xf32>
    %cst_12 = arith.constant dense<0.000000e+00> : vector<16x32xf32>
    %11 = tpu.matmul %10, %1, %cst_12 {dimension_numbers = #tpu.dot_dimension_numbers<[1], [0], [0], [1], [0, 0, 1, 1], [], []>} : vector<16x16xf32>, vector<16x32xf32>, vector<16x32xf32> -> vector<16x32xf32>
    %cst_13 = arith.constant dense<0.000000e+00> : vector<32x32xf32>
    %12 = tpu.matmul %0, %11, %cst_13 {dimension_numbers = #tpu.dot_dimension_numbers<[1], [0], [0], [1], [0, 0, 1, 1], [], []>} : vector<32x16xf32>, vector<16x32xf32>, vector<32x32xf32> -> vector<32x32xf32>
    %c1_14 = arith.constant 1 : index
    %c0_15 = arith.constant 0 : index
    %c0_16 = arith.constant 0 : index
    %13 = vector.load %arg5[%c1_14, %c0_15, %c0_16] : memref<4x32x32xf32, #tpu.memory_space<vmem>>, vector<1x32x32xf32>
    %14 = vector.shape_cast %13 : vector<1x32x32xf32> to vector<32x32xf32>
    %15 = vector.shape_cast %12 : vector<32x32xf32> to vector<1x32x32xf32>
    tpu.vector_store %arg5[%c1_14, %c0_15, %c0_16], %15 {strides = array<i32>} : memref<4x32x32xf32, #tpu.memory_space<vmem>>, vector<1x32x32xf32>,
    %c2 = arith.constant 2 : index
    %c0_17 = arith.constant 0 : index
    %c0_18 = arith.constant 0 : index
    %16 = vector.load %arg4[%c2, %c0_17, %c0_18] : memref<4x16x16xf32, #tpu.memory_space<vmem>>, vector<1x16x16xf32>
    %17 = vector.shape_cast %16 : vector<1x16x16xf32> to vector<16x16xf32>
    %cst_19 = arith.constant dense<0.000000e+00> : vector<16x32xf32>
    %18 = tpu.matmul %17, %1, %cst_19 {dimension_numbers = #tpu.dot_dimension_numbers<[1], [0], [0], [1], [0, 0, 1, 1], [], []>} : vector<16x16xf32>, vector<16x32xf32>, vector<16x32xf32> -> vector<16x32xf32>
    %cst_20 = arith.constant dense<0.000000e+00> : vector<32x32xf32>
    %19 = tpu.matmul %0, %18, %cst_20 {dimension_numbers = #tpu.dot_dimension_numbers<[1], [0], [0], [1], [0, 0, 1, 1], [], []>} : vector<32x16xf32>, vector<16x32xf32>, vector<32x32xf32> -> vector<32x32xf32>
    %c2_21 = arith.constant 2 : index
    %c0_22 = arith.constant 0 : index
    %c0_23 = arith.constant 0 : index
    %20 = vector.load %arg5[%c2_21, %c0_22, %c0_23] : memref<4x32x32xf32, #tpu.memory_space<vmem>>, vector<1x32x32xf32>
    %21 = vector.shape_cast %20 : vector<1x32x32xf32> to vector<32x32xf32>
    %22 = vector.shape_cast %19 : vector<32x32xf32> to vector<1x32x32xf32>
    tpu.vector_store %arg5[%c2_21, %c0_22, %c0_23], %22 {strides = array<i32>} : memref<4x32x32xf32, #tpu.memory_space<vmem>>, vector<1x32x32xf32>,
    %c3 = arith.constant 3 : index
    %c0_24 = arith.constant 0 : index
    %c0_25 = arith.constant 0 : index
    %23 = vector.load %arg4[%c3, %c0_24, %c0_25] : memref<4x16x16xf32, #tpu.memory_space<vmem>>, vector<1x16x16xf32>
    %24 = vector.shape_cast %23 : vector<1x16x16xf32> to vector<16x16xf32>
    %cst_26 = arith.constant dense<0.000000e+00> : vector<16x32xf32>
    %25 = tpu.matmul %24, %1, %cst_26 {dimension_numbers = #tpu.dot_dimension_numbers<[1], [0], [0], [1], [0, 0, 1, 1], [], []>} : vector<16x16xf32>, vector<16x32xf32>, vector<16x32xf32> -> vector<16x32xf32>
    %cst_27 = arith.constant dense<0.000000e+00> : vector<32x32xf32>
    %26 = tpu.matmul %0, %25, %cst_27 {dimension_numbers = #tpu.dot_dimension_numbers<[1], [0], [0], [1], [0, 0, 1, 1], [], []>} : vector<32x16xf32>, vector<16x32xf32>, vector<32x32xf32> -> vector<32x32xf32>
    %c3_28 = arith.constant 3 : index
    %c0_29 = arith.constant 0 : index
    %c0_30 = arith.constant 0 : index
    %27 = vector.load %arg5[%c3_28, %c0_29, %c0_30] : memref<4x32x32xf32, #tpu.memory_space<vmem>>, vector<1x32x32xf32>
    %28 = vector.shape_cast %27 : vector<1x32x32xf32> to vector<32x32xf32>
    %29 = vector.shape_cast %26 : vector<32x32xf32> to vector<1x32x32xf32>
    tpu.vector_store %arg5[%c3_28, %c0_29, %c0_30], %29 {strides = array<i32>} : memref<4x32x32xf32, #tpu.memory_space<vmem>>, vector<1x32x32xf32>,
    return
  }
  func.func @transform_0(%arg0: i32, %arg1: i32) -> (i32, i32) {
    %c0_i32 = arith.constant 0 : i32
    %c0_i32_0 = arith.constant 0 : i32
    %c0_i32_1 = arith.constant 0 : i32
    return %c0_i32, %c0_i32_0 : i32, i32
  }
  func.func @transform_1(%arg0: i32, %arg1: i32) -> (i32, i32) {
    %c0_i32 = arith.constant 0 : i32
    %c0_i32_0 = arith.constant 0 : i32
    return %c0_i32, %arg1 : i32, i32
  }
  func.func @transform_2(%arg0: i32, %arg1: i32) -> (i32, i32, i32) {
    %c0_i32 = arith.constant 0 : i32
    %c0_i32_0 = arith.constant 0 : i32
    %c0_i32_1 = arith.constant 0 : i32
    return %arg0, %c0_i32, %c0_i32_0 : i32, i32, i32
  }
  func.func @transform_3(%arg0: i32, %arg1: i32) -> (i32, i32, i32) {
    %c0_i32 = arith.constant 0 : i32
    %c0_i32_0 = arith.constant 0 : i32
    return %arg0, %c0_i32, %arg1 : i32, i32, i32
  }
}

</mosaic_0001>

<bundles_post_ra>
// kernel: tpu_custom_call.1
= control target key start
LH: loop header
LB: loop body
LE: loop exit
PB: predicated region body
PF: predicated region fallthrough
CT: control target
= control target key end

     0   :  { %8 = vsyncpa [#allocation3], 0  ;;  %s1724_s0 = inlined_call_operand.vmem [shape: f32[32,16], index: 0, kind: input, shape index: {}]   ;;  %s1725_s1 = inlined_call_operand.vmem [shape: f32[16,32], index: 1, kind: input, shape index: {}]   ;;  %s1726_s2 = inlined_call_operand.hbm [shape: f32[8,16,16], index: 2, kind: input, shape index: {}]   ;;  %s1727_s3 = inlined_call_operand.hbm [shape: f32[8,32,32], index: 3, kind: output, shape index: {}]  }
   0x1   :  { %10 = vsyncpa [#allocation3 + $0x1], 0 }
   0x2   :  { %11 = vsyncpa [#allocation4], 0 }
   0x3   :  { %13 = vsyncpa [#allocation4 + $0x1], 0  ;;  %s1461_s12 = smov 0   ;;  %s1463_s13 = smov 0  }
   0x4   :  { %s1465_s14 = smov 0   ;;  %s1467_s15 = smov 0  }
   0x5   :  { %s1469_s16 = smov 0   ;;  %s1471_s17 = smov 0  }
   0x6 LB: > { %s1051_s18 = sadd.s32 4294967295, %s1433_s17   ;;  %s1052_s19 = sadd.s32 4294967294, %s1433_s17   ;;  %s1433_s17 = sphi %s1471_s17, %s19_s17   ;;  %s1429_s16 = sphi %s1469_s16, %s1742_s16   ;;  %s1425_s15 = sphi %s1467_s15, %s1741_s15   ;;  %s1421_s14 = sphi %s1465_s14, %s1740_s14   ;;  %s1417_s13 = sphi %s1463_s13, %s1739_s13   ;;  %s1413_s12 = sphi %s1461_s12, %s1738_s12  }
   0x7   : > { %s31_s20 = sadd.s32 1, %s1429_s16  ;;  %s85_s21 = sadd.s32 1, %s1421_s14 }
   0x8   : > { %p33_p0 = scmp.ge.s32.totalorder %s31_s20, 2  ;;  %p92_p1 = scmp.ne.s32.totalorder %s1421_s14, %s1417_s13 }
   0x9   : > { %p93_p2 = scmp.eq.s32.totalorder %s1433_s17, 0  ;;  %p98_p3 = scmp.ne.s32.totalorder %s1417_s13, %s1413_s12 }
   0xa   : > { %s1744_s20 = smov (%p33_p0, %s31_s20), 0  ;;  %p99_p5 = scmp.eq.s32.totalorder %s1051_s18, 0 }
   0xb   : > { %p1502_p4 = por %p93_p2, %p92_p1  ;;  %s82_s23 = ssub.s32 %s1429_s16, %s1744_s20 }
   0xc   : > { %p124_p6 = scmp.eq.s32.totalorder %s1051_s18, 1  ;;  %p83_p7 = scmp.eq.s32.totalorder %s82_s23, 0 }
   0xd   : > { %p1508_p8 = por %p99_p5, %p98_p3  ;;  %p130_p10 = scmp.eq.s32.totalorder %s1052_s19, 1 }
   0xe   : > { %p1512_p9 = por %p124_p6, %p92_p1  ;;  %p1267_p13 = scmp.lt.s32.totalorder %s1433_s17, 2 }
   0xf   : > { %s1517_s26 = scalar_select %p83_p7, %s1421_s14, %s85_s21  }
  0x10   : > { %s1731_s25 = scalar_select %p1512_p9, 1, 0 }
  0x11   : > { %p1519_p11 = por %p130_p10, %p98_p3  ;;  %s160_s28 = sand.u32 1, %s1421_s14  }
  0x12   : > { %s1056_s29 = sshll.u32 %s160_s28, 6  ;;  %s1112_s30 = sshll.u32 %s1429_s16, 10 }
  0x13   : > { %s1732_s27 = scalar_select %p1519_p11, 1, 0 }
  0x14   : > { %s1530_s6 = scalar_lea.hbm %s1726_s2, %s1112_s30  ;;  %s164_s7 = scalar_lea.vmem [#allocation2], %s1056_s29 }
  0x15   : > { %s172_s8 = sshll.u32 %s164_s7, 4  ;;  %p1536_p0 = pnand %p1267_p13, %p1502_p4  ;;  %s1532_s8 = int_to_ptr.vmem [resolvable:$true] %s172_s8 }
  0x16   : > { %s1541_s10 = scalar_lea.sflag [#allocation3], %s160_s28  ;;  %s1321_s11 = scalar_lea.hbm %s1530_s6, 1024 }
  0x17   : > { %p1322_p2 = scmp.ne.s32.totalorder %s1530_s6, %s1321_s11  ;;  %p1323_p3 = pneg %p1536_p0 }
  0x18   : > { %s1326_s21 = scalar_lea.hbm %s1726_s2, 2048  ;;  %p1327_p4 = scmp.lt.u32.totalorder %s1530_s6, %s1726_s2 }
  0x19   : > { %p1324_p5 = pnand %p1323_p3, %p1322_p2  ;;  %p1328_p7 = scmp.lt.u32.totalorder %s1326_s21, %s1321_s11 }
  0x1a   : > { %p1330_p13 = scmp.lt.u32.totalorder %s1321_s11, %s1530_s6 }
  0x1b   : > { %p1325_p6 = pneg %p1324_p5  ;;  %p1329_p10 = por %p1328_p7, %p1327_p4 }
  0x1d   : > { %p1331_p12 = por %p1330_p13, %p1329_p10 }
  0x1f   : > { %p1332_p1 = pnand %p1331_p12, %p1325_p6 }
  0x21   : > { %1335 = shalt.err (!%p1332_p1)
}
  0x22   : > { %s1336_s28 = scalar_lea.vmem %s1532_s8, 1024  ;;  %s1435_s29 = smov [#allocation2]  }
  0x23   : > { %p1337_p2 = scmp.ne.s32.totalorder %s1532_s8, %s1336_s28  ;;  %s1341_s30 = sshll.u32 %s1435_s29, 4  ;;  %s1342_s30 = int_to_ptr.vmem [resolvable:$false] %s1341_s30 }
  0x24   : > { %s1343_s4 = scalar_lea.vmem %s1342_s30, 2048  ;;  %p1344_p9 = scmp.lt.s32.totalorder %s1532_s8, %s1342_s30 }
  0x25   : > { %p1339_p5 = pnand %p1337_p2, %p1323_p3  ;;  %p1345_p4 = scmp.lt.s32.totalorder %s1343_s4, %s1336_s28 }
  0x27   : > { %p1340_p11 = pneg %p1339_p5  ;;  %p1346_p7 = por %p1345_p4, %p1344_p9 }
  0x29   : > { %p1347_p10 = pnand %p1346_p7, %p1340_p11 }
  0x2b   : > { %1350 = shalt.err (!%p1347_p10)
}
  0x2c   : > { %s1436_s5 = smov 128   ;;  %s1437_s7 = smov 8  }
  0x2d   : > { %1262 = dma.hbm_to_vmem [thread:$0]  (!%p1536_p0), %s1530_s6, 1024, %s1532_s8, %s1541_s10, %s1436_s5, %s1436_s5, %s1437_s7  }
  0x2e   : > { %p180_p12 = scmp.lt.s32.totalorder %s1433_s17, 3  ;;  %p1734_p1 = scmp.ge.s32.totalorder %s1433_s17, 1 }
  0x30   : > { %p181_p3 = pnand %p1734_p1, %p180_p12 }
  0x31   : > { %s1573_s11 = sand.u32 (!%p181_p3), 1, %s1417_s13  }
  0x32   : > { %184 = sbr.rel (%p181_p3) target bundleno = 743 (0x2e7), region = 32  ;;  %s1061_s18 = sshll.u32 (!%p181_p3), %s1573_s11, 6 }
  0x33   : > { %s187_s19 = scalar_lea.sflag (!%p181_p3), [#allocation3], %s1573_s11  ;;  %s1577_s21 = scalar_lea.vmem (!%p181_p3), [#allocation2], %s1061_s18 }
  0x39   : > { %1404 = dma.done.wait (%p1508_p8), %s187_s19, 1024  }
  0x3a   : > { %1406 = vsyncadd (%p1508_p8), %s187_s19, 4294966272  ;;  %vm231_vm0 = vcmask 130048   ;;  %v227_v0 = vld [vmem:[%s1725_s1] sm:$0xff]  ;;  %v228_v1 = vld [vmem:[%s1725_s1 + $0x8] sm:$0xff]  ;;  %s1062_s7 = sshll.u32 %s1573_s11, 7  ;;  %vm410_vm1 = vcmask 261120  }
  0x3b   : > { %v229_v2 = vld [vmem:[%s1577_s21] sm:$0xff]  ;;  %v1223_v3 = vpack.c.bf16 %v228_v1, %v227_v0  ;;  %v1069_v4 = vld [vmem:[%s1577_s21 + $0x10] sm:$0xff]  ;;  %v230_v5 = vld [vmem:[%s1577_s21 + $0x8] sm:$0xff]  ;;  %s1628_s18 = scalar_lea.vmem [#allocation5], %s1062_s7  ;;  %s1114_s19 = sshll.u32 %s1425_s15, 11 }
  0x3c   : > { %1159 = vmatprep.mubr.msk.f32.mxu1 %vm231_vm0, %v229_v2  ;;  %1176 = vmatprep.mubr.msk.f32.mxu0 %vm231_vm0, %v1069_v4  ;;  %v1070_v6 = vld [vmem:[%s1577_s21 + $0x18] sm:$0xff]  ;;  %v223_v7 = vld [vmem:[%s1724_s0] sm:$0xff]  ;;  %v225_v15 = vld [vmem:[%s1724_s0 + $0x10] sm:$0xff]  ;;  %s1665_s9 = scalar_lea.hbm %s1727_s3, %s1114_s19  ;;  %s938_s15 = scalar_lea.sflag [#allocation4], %s1573_s11 }
  0x3d   : > { %1224 = vmatprep.subr.bf16.mxu1 %v1223_v3  ;;  %1232 = vmatprep.subr.bf16.mxu0 %v1223_v3  ;;  %v224_v14 = vld [vmem:[%s1724_s0 + $0x8] sm:$0xff]  ;;  %v226_v16 = vld [vmem:[%s1724_s0 + $0x18] sm:$0xff]  ;;  %v1081_v17 = vld [vmem:[%s1577_s21 + $0x20] sm:$0xff]  ;;  %p1735_p9 = scmp.ne.s32.totalorder %s1731_s25, 0  ;;  %s1438_s24 = smov [#allocation5]  }
  0x3e   : > { %1226 = vmatpush3.bf16.msra.mxu1 %v1223_v3  ;;  %1234 = vmatpush3.bf16.msra.mxu0 %v1223_v3  ;;  %v1093_v18 = vld [vmem:[%s1577_s21 + $0x30] sm:$0xff]  ;;  %v1082_v19 = vld [vmem:[%s1577_s21 + $0x28] sm:$0xff]  ;;  %v1094_v20 = vld [vmem:[%s1577_s21 + $0x38] sm:$0xff]  ;;  %s953_s21 = sshll.u32 %s1628_s18, 4  ;;  %s1355_s22 = sshll.u32 %s1438_s24, 4  ;;  %s1667_s21 = int_to_ptr.vmem [resolvable:$true] %s953_s21  ;;  %s1356_s22 = int_to_ptr.vmem [resolvable:$false] %s1355_s22 }
  0x3f   : > { %s1351_s10 = scalar_lea.vmem %s1667_s21, 2048  ;;  %s1357_s23 = scalar_lea.vmem %s1356_s22, 4096 }
  0x40   : > { %p1352_p8 = scmp.ne.s32.totalorder %s1667_s21, %s1351_s10  ;;  %p1358_p6 = scmp.lt.s32.totalorder %s1667_s21, %s1356_s22 }
  0x41   : > { %1160 = vmatmul.mubr.msk.f32.vlgmr.msra.gmra.mrb[0].mxu1 %vm231_vm0, %v230_v5  ;;  %1177 = vmatmul.mubr.msk.f32.vlgmr.msra.gmra.mrb[0].mxu0 %vm231_vm0, %v1070_v6  ;;  %p1359_p13 = scmp.lt.s32.totalorder %s1357_s23, %s1351_s10 }
  0x42   : > { %1166 = vmatprep.mubr.msk.f32.mxu1 %vm231_vm0, %v223_v7  ;;  %1183 = vmatprep.mubr.msk.f32.mxu0 %vm231_vm0, %v223_v7  ;;  %p1353_p11 = pnand %p1352_p8, %p1735_p9 }
  0x43   : > { %p1360_p2 = por %p1359_p13, %p1358_p6 }
  0x44   : > { %p1354_p0 = pneg %p1353_p11 }
  0x46   : > { %p1361_p5 = pnand %p1360_p2, %p1354_p0 }
 0x114   : > { %v1161_v8 = vpop.f32.mrb[0].mxu1  ;;  %v1178_v9 = vpop.f32.mrb[0].mxu0 }
 0x115   : > { %v304_v10 = vpop.f32.mrb[1].mxu1  ;;  %v490_v11 = vpop.f32.mrb[1].mxu0 }
 0x116   : > { %v1227_v12 = vpack.c.bf16 %v1161_v8, %v304_v10  ;;  %v1235_v13 = vpack.c.bf16 %v1178_v9, %v490_v11 }
 0x118   : > { %1228 = vmatprep.subr.bf16.mxu1 %v1227_v12  ;;  %1236 = vmatprep.subr.bf16.mxu0 %v1235_v13 }
 0x119   : > { %1230 = vmatpush3.bf16.msra.mxu1 %v1227_v12  ;;  %1238 = vmatpush3.bf16.msra.mxu0 %v1235_v13 }
 0x11a   : > { %1240 = vmatprep.subr.bf16.mxu1 %v1223_v3  ;;  %1248 = vmatprep.subr.bf16.mxu0 %v1223_v3 }
 0x11c   : > { %1167 = vmatmul.mubr.msk.f32.vlgmr.msra.gmra.mrb[2].mxu1 %vm231_vm0, %v224_v14  ;;  %1184 = vmatmul.mubr.msk.f32.vlgmr.msra.gmra.mrb[2].mxu0 %vm231_vm0, %v224_v14 }
 0x11d   : > { %1242 = vmatpush3.bf16.msra.mxu1 %v1223_v3  ;;  %1250 = vmatpush3.bf16.msra.mxu0 %v1223_v3 }
 0x11e   : > { %1169 = vmatprep.mubr.msk.f32.mxu1 %vm231_vm0, %v225_v15  ;;  %1186 = vmatprep.mubr.msk.f32.mxu0 %vm231_vm0, %v225_v15 }
 0x120   : > { %1170 = vmatmul.mubr.msk.f32.gmra.mrb[4].mxu1 %vm231_vm0, %v226_v16  ;;  %1187 = vmatmul.mubr.msk.f32.gmra.mrb[4].mxu0 %vm231_vm0, %v226_v16 }
 0x121   : > { %1193 = vmatprep.mubr.msk.f32.mxu1 %vm231_vm0, %v1081_v17  ;;  %1210 = vmatprep.mubr.msk.f32.mxu0 %vm231_vm0, %v1093_v18 }
 0x124   : > { %1194 = vmatmul.mubr.msk.f32.vlgmr.msra.gmra.mrb[6].mxu1 %vm231_vm0, %v1082_v19  ;;  %1211 = vmatmul.mubr.msk.f32.vlgmr.msra.gmra.mrb[6].mxu0 %vm231_vm0, %v1094_v20 }
 0x125   : > { %1200 = vmatprep.mubr.msk.f32.mxu1 %vm231_vm0, %v223_v7  ;;  %1217 = vmatprep.mubr.msk.f32.mxu0 %vm231_vm0, %v223_v7 }
 0x1ef   : > { %v1168_v21 = vpop.f32.mrb[2].mxu1  ;;  %v1185_v22 = vpop.f32.mrb[2].mxu0 }
 0x1f0   : > { %412 = vst.msk [vmem:[%s1628_s18 + $0x8] sm:$0xff] %vm410_vm1, %v1168_v21  ;;  %1078 = vst.msk [vmem:[%s1628_s18 + $0x28] sm:$0xff] %vm410_vm1, %v1185_v22  ;;  %v391_v23 = vpop.f32.mrb[3].mxu1  ;;  %v565_v24 = vpop.f32.mrb[3].mxu0 }
 0x1f1   : > { %411 = vst.msk [vmem:[%s1628_s18] sm:$0xff] %vm410_vm1, %v391_v23  ;;  %1077 = vst.msk [vmem:[%s1628_s18 + $0x20] sm:$0xff] %vm410_vm1, %v565_v24 }
 0x1f3   : > { %v1171_v25 = vpop.f32.mrb[4].mxu1  ;;  %v1188_v26 = vpop.f32.mrb[4].mxu0 }
 0x1f4   : > { %414 = vst.msk [vmem:[%s1628_s18 + $0x18] sm:$0xff] %vm410_vm1, %v1171_v25  ;;  %1080 = vst.msk [vmem:[%s1628_s18 + $0x38] sm:$0xff] %vm410_vm1, %v1188_v26  ;;  %v401_v27 = vpop.f32.mrb[5].mxu1  ;;  %v575_v28 = vpop.f32.mrb[5].mxu0 }
 0x1f5   : > { %413 = vst.msk [vmem:[%s1628_s18 + $0x10] sm:$0xff] %vm410_vm1, %v401_v27  ;;  %1079 = vst.msk [vmem:[%s1628_s18 + $0x30] sm:$0xff] %vm410_vm1, %v575_v28 }
 0x1f7   : > { %v1195_v29 = vpop.f32.mrb[6].mxu1  ;;  %v1212_v30 = vpop.f32.mrb[6].mxu0 }
 0x1f8   : > { %v664_v31 = vpop.f32.mrb[7].mxu1  ;;  %v838_v32 = vpop.f32.mrb[7].mxu0 }
 0x1f9   : > { %v1243_v33 = vpack.c.bf16 %v1195_v29, %v664_v31  ;;  %v1251_v34 = vpack.c.bf16 %v1212_v30, %v838_v32 }
 0x1fb   : > { %1244 = vmatprep.subr.bf16.mxu1 %v1243_v33  ;;  %1252 = vmatprep.subr.bf16.mxu0 %v1251_v34 }
 0x1fc   : > { %1246 = vmatpush3.bf16.msra.mxu1 %v1243_v33  ;;  %1254 = vmatpush3.bf16.msra.mxu0 %v1251_v34 }
 0x1ff   : > { %1201 = vmatmul.mubr.msk.f32.vlgmr.msra.gmra.mrb[8].mxu1 %vm231_vm0, %v224_v14  ;;  %1218 = vmatmul.mubr.msk.f32.vlgmr.msra.gmra.mrb[8].mxu0 %vm231_vm0, %v224_v14 }
 0x200   : > { %1203 = vmatprep.mubr.msk.f32.mxu1 %vm231_vm0, %v225_v15  ;;  %1220 = vmatprep.mubr.msk.f32.mxu0 %vm231_vm0, %v225_v15 }
 0x203   : > { %1204 = vmatmul.mubr.msk.f32.gmra.mrb[10].mxu1 %vm231_vm0, %v226_v16  ;;  %1221 = vmatmul.mubr.msk.f32.gmra.mrb[10].mxu0 %vm231_vm0, %v226_v16 }
 0x2d2   : > { %v1202_v35 = vpop.f32.mrb[8].mxu1  ;;  %v1219_v36 = vpop.f32.mrb[8].mxu0 }
 0x2d3   : > { %1090 = vst.msk [vmem:[%s1628_s18 + $0x48] sm:$0xff] %vm410_vm1, %v1202_v35  ;;  %1102 = vst.msk [vmem:[%s1628_s18 + $0x68] sm:$0xff] %vm410_vm1, %v1219_v36  ;;  %v739_v37 = vpop.f32.mrb[9].mxu1  ;;  %v913_v38 = vpop.f32.mrb[9].mxu0 }
 0x2d4   : > { %1089 = vst.msk [vmem:[%s1628_s18 + $0x40] sm:$0xff] %vm410_vm1, %v739_v37  ;;  %1101 = vst.msk [vmem:[%s1628_s18 + $0x60] sm:$0xff] %vm410_vm1, %v913_v38 }
 0x2d6   : > { %v1205_v39 = vpop.f32.mrb[10].mxu1  ;;  %v1222_v40 = vpop.f32.mrb[10].mxu0 }
 0x2d7   : > { %1092 = vst.msk [vmem:[%s1628_s18 + $0x58] sm:$0xff] %vm410_vm1, %v1205_v39  ;;  %1104 = vst.msk [vmem:[%s1628_s18 + $0x78] sm:$0xff] %vm410_vm1, %v1222_v40  ;;  %v749_v41 = vpop.f32.mrb[11].mxu1  ;;  %v923_v42 = vpop.f32.mrb[11].mxu0 }
 0x2d8   : > { %1091 = vst.msk [vmem:[%s1628_s18 + $0x50] sm:$0xff] %vm410_vm1, %v749_v41  ;;  %1103 = vst.msk [vmem:[%s1628_s18 + $0x70] sm:$0xff] %vm410_vm1, %v923_v42 }
 0x2d9   : > { %1364 = shalt.err (!%p1361_p5)
}
 0x2da   : > { %s1365_s28 = scalar_lea.hbm %s1665_s9, 2048  ;;  %s1369_s4 = scalar_lea.hbm %s1727_s3, 4096 }
 0x2db   : > { %p1366_p4 = scmp.ne.s32.totalorder %s1665_s9, %s1365_s28  ;;  %p1370_p12 = scmp.lt.u32.totalorder %s1665_s9, %s1727_s3 }
 0x2dc   : > { %p1371_p1 = scmp.lt.u32.totalorder %s1369_s4, %s1365_s28  ;;  %p1373_p8 = scmp.lt.u32.totalorder %s1365_s28, %s1665_s9 }
 0x2dd   : > { %p1367_p7 = pnand %p1366_p4, %p1735_p9 }
 0x2de   : > { %p1372_p3 = por %p1371_p1, %p1370_p12 }
 0x2df   : > { %p1368_p10 = pneg %p1367_p7 }
 0x2e0   : > { %p1374_p11 = por %p1373_p8, %p1372_p3 }
 0x2e2   : > { %p1375_p0 = pnand %p1374_p11, %p1368_p10 }
 0x2e4   : > { %1378 = shalt.err (!%p1375_p0)
}
 0x2e5   : > { %s1439_s18 = smov 128   ;;  %s1440_s19 = smov 8  }
 0x2e6   : > { %1257 = dma.vmem_to_hbm [thread:$0]  (%p1735_p9), %s1667_s21, 2048, %s1665_s9, %s938_s15, %s1439_s18, %s1439_s18, %s1440_s19  }
 0x2e7 PF: > { %s968_s6 = sand.u32 1, %s1413_s12   ;;  %p1736_p6 = scmp.ne.s32.totalorder %s1732_s27, 0 }
 0x2e8   : > { %p1737_p13 = scmp.ge.s32.totalorder %s1433_s17, 2  ;;  %s969_s8 = scalar_lea.sflag [#allocation4], %s968_s6 }
 0x2ea   : > { %p1264_p2 = pnand %p1737_p13, %p1736_p6 }
 0x2ec   : > { %1408 = dma.done.wait (!%p1264_p2), %s969_s8, 2048  }
 0x2ed   : > { %1410 = vsyncadd (!%p1264_p2), %s969_s8, 4294965248  ;;  %s19_s17 = sadd.s32 1, %s1433_s17   ;;  %s1738_s12 = smov %s1417_s13 }
 0x2ee   : > { %p16_p5 = scmp.ge.s32.totalorder %s19_s17, 4   ;;  %s1739_s13 = smov %s1421_s14 }
 0x2ef   : > { %s1740_s14 = smov %s1517_s26  ;;  %s1741_s15 = smov %s1429_s16 }
 0x2f0   : > { %s1742_s16 = smov %s1744_s20  ;;  %18 = sbr.rel (!%p16_p5) target bundleno = 6 (0x6), region = 86 }
 0x2f7   :  { %974 = vsyncpa [#allocation3], 1 }
 0x2f8   :  { %976 = vsyncpa [#allocation3 + $0x1], 1 }
 0x2f9   :  { %977 = vsyncpa [#allocation4], 1 }
 0x2fa   :  { %979 = vsyncpa [#allocation4 + $0x1], 1 }

</bundles_post_ra>
